<compile_context>
chip_gen: v6e
topology: v6e:2x2x1
jax: 0.10.0
libtpu: 0.0.40
codegen_flags: <defaults>
</compile_context>

<pallas_src>
import functools

import jax
import jax.numpy as jnp
from jax import lax
from jax.experimental import pallas as pl
from jax.experimental.pallas import tpu as pltpu

LANE = 128      # vreg lane width  (last dim)
SUBLANE = 8     # vreg sublane width (second-to-last dim)


# ----------------------------- Pallas kernel ---------------------------------

def _leaky(x, slope=0.1):
    return jnp.where(x > 0, x, slope * x)


def _resblockd_kernel(x_ref, w1_ref, b1_ref, w2_ref, b2_ref, o_ref, *, l_valid):
    # x_ref : (1, Lp, Cp)   f32 input, channels-last, lane-dense (Cp % 128 == 0)
    # wN_ref: (3*Cp, Cp)    bf16 im2col weights; row blocks ordered [tap x[l-1], x[l], x[l+1]]
    # bN_ref: (1, Cp)       f32 bias
    # o_ref : (1, Lp, Cp)   f32 output
    _, Lp, Cp = x_ref.shape

    def conv3(h_f32, w_ref, b_ref):
        # Build the shifted operands with the conv's zero padding baked in:
        #   h_prev[l] = h[l-1] (zero at l=0), h_next[l] = h[l+1] (zero at l=Lp-1).
        zero_row = jnp.zeros((1, Cp), jnp.float32)
        h_prev = jnp.concatenate([zero_row, h_f32[: Lp - 1, :]], axis=0)
        h_next = jnp.concatenate([h_f32[1:, :], zero_row], axis=0)
        # Fuse the 3 taps into a single MXU matmul with K = 3*Cp (lane-aligned concat).
        cols = jnp.concatenate(
            [h_prev.astype(jnp.bfloat16),
             h_f32.astype(jnp.bfloat16),
             h_next.astype(jnp.bfloat16)],
            axis=-1)                                             # (Lp, 3*Cp) bf16
        y = jnp.dot(cols, w_ref[...], preferred_element_type=jnp.float32)
        return y + b_ref[...]                                    # f32 bias add

    # --- LeakyReLU(0.1) -> conv1 -> LeakyReLU(0.1) -> conv2 ---
    h = _leaky(x_ref[0, :, :])
    h = conv3(h, w1_ref, b1_ref)
    h = _leaky(h)
    if l_valid < Lp:
        # Rows >= l_valid are wrapper-side L padding; conv2 must see zeros there
        # (matches the module's zero padding at position L).  Static no-op otherwise.
        row = lax.broadcasted_iota(jnp.int32, (Lp, 1), 0)
        h = jnp.where(row < l_valid, h, 0.0)
    h = conv3(h, w2_ref, b2_ref)

    # --- identity bypass: re-read x (cheap vld) instead of keeping it live ---
    o_ref[0, :, :] = (h + x_ref[0, :, :]).astype(o_ref.dtype)


# ----------------------------- wrapper ---------------------------------------

def _round_up(n, m):
    return ((n + m - 1) // m) * m


def _prep_weight(w_sn, C, Cp):
    """(Cout, Cin, 3) f32 -> (3*Cp, Cp) bf16 im2col weight, zero-padded channels."""
    w_pad = jnp.zeros((Cp, Cp, 3), jnp.float32).at[:C, :C, :].set(w_sn)
    # tap k pairs with input x[l + k - 1]; each block maps Cin -> Cout.
    w_cat = jnp.concatenate([w_pad[:, :, k].T for k in range(3)], axis=0)
    return w_cat.astype(jnp.bfloat16)


def resblockd_forward(x_ncl, w1_sn, b1, w2_sn, b2):
    """x_ncl: (B, C, L) NCL like PyTorch; weights (Cout, Cin, 3) already spectral-normalized."""
    B, C, L = x_ncl.shape
    Cp = _round_up(C, LANE)        # lane-dense channel dim
    Lp = _round_up(L, SUBLANE)     # sublane-aligned sequence dim

    # NCL -> NLC so channels sit on the 128-wide lane axis; zero-pad C and L.
    x_blc = jnp.transpose(x_ncl, (0, 2, 1)).astype(jnp.float32)
    x_pad = jnp.zeros((B, Lp, Cp), jnp.float32).at[:, :L, :C].set(x_blc)

    w1k = _prep_weight(w1_sn, C, Cp)
    w2k = _prep_weight(w2_sn, C, Cp)
    b1p = jnp.zeros((1, Cp), jnp.float32).at[0, :C].set(b1)
    b2p = jnp.zeros((1, Cp), jnp.float32).at[0, :C].set(b2)

    kernel = functools.partial(_resblockd_kernel, l_valid=L)

    out_pad = pl.pallas_call(
        kernel,
        out_shape=jax.ShapeDtypeStruct((B, Lp, Cp), x_ncl.dtype),
        grid=(B,),
        in_specs=[
            pl.BlockSpec((1, Lp, Cp), lambda b: (b, 0, 0)),
            pl.BlockSpec((3 * Cp, Cp), lambda b: (0, 0)),    # same block every step -> DMA'd once
            pl.BlockSpec((1, Cp), lambda b: (0, 0)),
            pl.BlockSpec((3 * Cp, Cp), lambda b: (0, 0)),
            pl.BlockSpec((1, Cp), lambda b: (0, 0)),
        ],
        out_specs=pl.BlockSpec((1, Lp, Cp), lambda b: (b, 0, 0)),
        compiler_params=pltpu.CompilerParams(
            dimension_semantics=("parallel",),
            vmem_limit_bytes=32 * 1024 * 1024,   # safe on v5e/v6e/v7x
        ),
    )(x_pad, w1k, b1p, w2k, b2p)

    # slice off channel/length padding, back to PyTorch NCL layout.
    return jnp.transpose(out_pad[:, :L, :C], (0, 2, 1))


# ----------------------- parameter init (deterministic) ----------------------

def xavier_uniform(key, shape, gain=1.0):
    cout, cin, k = shape
    fan_in, fan_out = cin * k, cout * k
    bound = gain * jnp.sqrt(6.0 / (fan_in + fan_out))
    return jax.random.uniform(key, shape, jnp.float32, -bound, bound)


def conv_bias_init(key, cout, cin, k):
    bound = 1.0 / jnp.sqrt(cin * k)
    return jax.random.uniform(key, (cout,), jnp.float32, -bound, bound)


def l2normalize(v, eps=1e-12):
    return v / (jnp.linalg.norm(v) + eps)


def spectral_normalize(w, u, n_power_iterations=1):
    """Standard GAN SpectralNorm: one power iteration, return w / sigma."""
    w_mat = w.reshape(w.shape[0], -1)                      # (Cout, Cin*K)
    v = l2normalize(w_mat.T @ u)
    for _ in range(n_power_iterations):
        v = l2normalize(w_mat.T @ u)
        u = l2normalize(w_mat @ v)
    sigma = u @ (w_mat @ v)
    return w / sigma


# ----------------------------- pure-JAX reference ----------------------------

def ref_forward(x_ncl, w1, b1, w2, b2):
    # Mirrors the kernel's precision recipe: bf16 matmul inputs, f32 accumulation,
    # all element-wise math in f32.
    def conv1d(h, w, b):
        y = lax.conv_general_dilated(
            h.astype(jnp.bfloat16), w.astype(jnp.bfloat16),
            window_strides=(1,), padding=[(1, 1)],
            dimension_numbers=("NCH", "OIH", "NCH"),
            preferred_element_type=jnp.float32)
        return y + b[None, :, None]

    h = jnp.where(x_ncl > 0, x_ncl, 0.1 * x_ncl)
    h = conv1d(h, w1, b1)
    h = jnp.where(h > 0, h, 0.1 * h)
    h = conv1d(h, w2, b2)
    return h + x_ncl


# ----------------------------- main -------------------------------------------

if __name__ == "__main__":
    B, hidden, L = 2, 32, 16

    key = jax.random.PRNGKey(0)
    k_x, k_w1, k_b1, k_w2, k_b2, k_u1, k_u2 = jax.random.split(key, 7)

    x = jax.random.normal(k_x, (B, hidden, L), jnp.float32)           # NCL, like PyTorch

    w1 = xavier_uniform(k_w1, (hidden, hidden, 3), gain=1.0)
    b1 = conv_bias_init(k_b1, hidden, hidden, 3)
    w2 = xavier_uniform(k_w2, (hidden, hidden, 3), gain=1.0)
    b2 = conv_bias_init(k_b2, hidden, hidden, 3)

    # SpectralNorm u-vectors (deterministic), one power iteration per forward.
    u1 = l2normalize(jax.random.normal(k_u1, (hidden,), jnp.float32))
    u2 = l2normalize(jax.random.normal(k_u2, (hidden,), jnp.float32))
    w1_sn = spectral_normalize(w1, u1)
    w2_sn = spectral_normalize(w2, u2)

    out = resblockd_forward(x, w1_sn, b1, w2_sn, b2)
    out = jax.block_until_ready(out)

    ref = ref_forward(x, w1_sn, b1, w2_sn, b2)
    assert out.shape == (B, hidden, L)
    assert jnp.allclose(out, ref, atol=2e-3, rtol=2e-3), "mismatch vs JAX reference"

    print("KERNEL_OK")
</pallas_src>

<mosaic_0001>
module attributes {stable_mosaic.version = 11 : i64} {
  func.func @_resblockd_kernel(%arg0: i32, %arg1: memref<1x16x128xf32, #tpu.memory_space<vmem>>, %arg2: memref<384x128xbf16, #tpu.memory_space<vmem>>, %arg3: memref<1x128xf32, #tpu.memory_space<vmem>>, %arg4: memref<384x128xbf16, #tpu.memory_space<vmem>>, %arg5: memref<1x128xf32, #tpu.memory_space<vmem>>, %arg6: memref<1x16x128xf32, #tpu.memory_space<vmem>>) attributes {dimension_semantics = [#tpu.dimension_semantics<parallel>], iteration_bounds = array<i64: 2>, scalar_prefetch = 0 : i64, scratch_operands = 0 : i64, tpu.core_type = #tpu.core_type<tc>, window_params = [{transform_indices = @transform_0, window_bounds = array<i64: 1, 16, 128>}, {pipeline_mode = #tpu.pipeline_mode<synchronous>, transform_indices = @transform_1, window_bounds = array<i64: 384, 128>}, {pipeline_mode = #tpu.pipeline_mode<synchronous>, transform_indices = @transform_2, window_bounds = array<i64: 1, 128>}, {pipeline_mode = #tpu.pipeline_mode<synchronous>, transform_indices = @transform_3, window_bounds = array<i64: 384, 128>}, {pipeline_mode = #tpu.pipeline_mode<synchronous>, transform_indices = @transform_4, window_bounds = array<i64: 1, 128>}, {transform_indices = @transform_5, window_bounds = array<i64: 1, 16, 128>}]} {
    %c0 = arith.constant 0 : index
    %c0_0 = arith.constant 0 : index
    %c0_1 = arith.constant 0 : index
    %0 = vector.load %arg1[%c0, %c0_0, %c0_1] : memref<1x16x128xf32, #tpu.memory_space<vmem>>, vector<1x16x128xf32>
    %1 = vector.shape_cast %0 : vector<1x16x128xf32> to vector<16x128xf32>
    %cst = arith.constant 0.000000e+00 : f32
    %2 = vector.broadcast %cst : f32 to vector<16x128xf32>
    %3 = arith.cmpf ogt, %1, %2 : vector<16x128xf32>
    %cst_2 = arith.constant 1.000000e-01 : f32
    %4 = vector.broadcast %cst_2 : f32 to vector<16x128xf32>
    %5 = arith.mulf %4, %1 : vector<16x128xf32>
    %6 = arith.select %3, %1, %5 : vector<16x128xi1>, vector<16x128xf32>
    %cst_3 = arith.constant 0.000000e+00 : f32
    %7 = vector.broadcast %cst_3 : f32 to vector<1x128xf32>
    %8 = vector.extract_strided_slice %6 {offsets = [0, 0], sizes = [15, 128], strides = [1, 1]} : vector<16x128xf32> to vector<15x128xf32>
    %9 = tpu.concatenate %7, %8 in 0 : vector<1x128xf32>, vector<15x128xf32> -> vector<16x128xf32>
    %10 = vector.extract_strided_slice %6 {offsets = [1, 0], sizes = [15, 128], strides = [1, 1]} : vector<16x128xf32> to vector<15x128xf32>
    %11 = tpu.concatenate %10, %7 in 0 : vector<15x128xf32>, vector<1x128xf32> -> vector<16x128xf32>
    %12 = arith.truncf %9 : vector<16x128xf32> to vector<16x128xbf16>
    %13 = arith.truncf %6 : vector<16x128xf32> to vector<16x128xbf16>
    %14 = arith.truncf %11 : vector<16x128xf32> to vector<16x128xbf16>
    %15 = tpu.concatenate %12, %13, %14 in 1 : vector<16x128xbf16>, vector<16x128xbf16>, vector<16x128xbf16> -> vector<16x384xbf16>
    %c0_4 = arith.constant 0 : index
    %c0_5 = arith.constant 0 : index
    %16 = vector.load %arg2[%c0_4, %c0_5] : memref<384x128xbf16, #tpu.memory_space<vmem>>, vector<384x128xbf16>
    %cst_6 = arith.constant dense<0.000000e+00> : vector<16x128xf32>
    %17 = tpu.matmul %15, %16, %cst_6 {dimension_numbers = #tpu.dot_dimension_numbers<[1], [0], [0], [1], [0, 0, 1, 1], [], []>} : vector<16x384xbf16>, vector<384x128xbf16>, vector<16x128xf32> -> vector<16x128xf32>
    %c0_7 = arith.constant 0 : index
    %c0_8 = arith.constant 0 : index
    %18 = vector.load %arg3[%c0_7, %c0_8] : memref<1x128xf32, #tpu.memory_space<vmem>>, vector<1x128xf32>
    %19 = vector.broadcast %18 : vector<1x128xf32> to vector<16x128xf32>
    %20 = arith.addf %17, %19 : vector<16x128xf32>
    %cst_9 = arith.constant 0.000000e+00 : f32
    %21 = vector.broadcast %cst_9 : f32 to vector<16x128xf32>
    %22 = arith.cmpf ogt, %20, %21 : vector<16x128xf32>
    %cst_10 = arith.constant 1.000000e-01 : f32
    %23 = vector.broadcast %cst_10 : f32 to vector<16x128xf32>
    %24 = arith.mulf %23, %20 : vector<16x128xf32>
    %25 = arith.select %22, %20, %24 : vector<16x128xi1>, vector<16x128xf32>
    %cst_11 = arith.constant 0.000000e+00 : f32
    %26 = vector.broadcast %cst_11 : f32 to vector<1x128xf32>
    %27 = vector.extract_strided_slice %25 {offsets = [0, 0], sizes = [15, 128], strides = [1, 1]} : vector<16x128xf32> to vector<15x128xf32>
    %28 = tpu.concatenate %26, %27 in 0 : vector<1x128xf32>, vector<15x128xf32> -> vector<16x128xf32>
    %29 = vector.extract_strided_slice %25 {offsets = [1, 0], sizes = [15, 128], strides = [1, 1]} : vector<16x128xf32> to vector<15x128xf32>
    %30 = tpu.concatenate %29, %26 in 0 : vector<15x128xf32>, vector<1x128xf32> -> vector<16x128xf32>
    %31 = arith.truncf %28 : vector<16x128xf32> to vector<16x128xbf16>
    %32 = arith.truncf %25 : vector<16x128xf32> to vector<16x128xbf16>
    %33 = arith.truncf %30 : vector<16x128xf32> to vector<16x128xbf16>
    %34 = tpu.concatenate %31, %32, %33 in 1 : vector<16x128xbf16>, vector<16x128xbf16>, vector<16x128xbf16> -> vector<16x384xbf16>
    %c0_12 = arith.constant 0 : index
    %c0_13 = arith.constant 0 : index
    %35 = vector.load %arg4[%c0_12, %c0_13] : memref<384x128xbf16, #tpu.memory_space<vmem>>, vector<384x128xbf16>
    %cst_14 = arith.constant dense<0.000000e+00> : vector<16x128xf32>
    %36 = tpu.matmul %34, %35, %cst_14 {dimension_numbers = #tpu.dot_dimension_numbers<[1], [0], [0], [1], [0, 0, 1, 1], [], []>} : vector<16x384xbf16>, vector<384x128xbf16>, vector<16x128xf32> -> vector<16x128xf32>
    %c0_15 = arith.constant 0 : index
    %c0_16 = arith.constant 0 : index
    %37 = vector.load %arg5[%c0_15, %c0_16] : memref<1x128xf32, #tpu.memory_space<vmem>>, vector<1x128xf32>
    %38 = vector.broadcast %37 : vector<1x128xf32> to vector<16x128xf32>
    %39 = arith.addf %36, %38 : vector<16x128xf32>
    %c0_17 = arith.constant 0 : index
    %c0_18 = arith.constant 0 : index
    %c0_19 = arith.constant 0 : index
    %40 = vector.load %arg1[%c0_17, %c0_18, %c0_19] : memref<1x16x128xf32, #tpu.memory_space<vmem>>, vector<1x16x128xf32>
    %41 = vector.shape_cast %40 : vector<1x16x128xf32> to vector<16x128xf32>
    %42 = arith.addf %39, %41 : vector<16x128xf32>
    %c0_20 = arith.constant 0 : index
    %c0_21 = arith.constant 0 : index
    %c0_22 = arith.constant 0 : index
    %43 = vector.load %arg6[%c0_20, %c0_21, %c0_22] : memref<1x16x128xf32, #tpu.memory_space<vmem>>, vector<1x16x128xf32>
    %44 = vector.shape_cast %43 : vector<1x16x128xf32> to vector<16x128xf32>
    %45 = vector.shape_cast %42 : vector<16x128xf32> to vector<1x16x128xf32>
    tpu.vector_store %arg6[%c0_20, %c0_21, %c0_22], %45 {strides = array<i32>} : memref<1x16x128xf32, #tpu.memory_space<vmem>>, vector<1x16x128xf32>,
    return
  }
  func.func @transform_0(%arg0: i32) -> (i32, i32, i32) {
    %c0_i32 = arith.constant 0 : i32
    %c0_i32_0 = arith.constant 0 : i32
    %c0_i32_1 = arith.constant 0 : i32
    return %arg0, %c0_i32, %c0_i32_0 : i32, i32, i32
  }
  func.func @transform_1(%arg0: i32) -> (i32, i32) {
    %c0_i32 = arith.constant 0 : i32
    %c0_i32_0 = arith.constant 0 : i32
    %c0_i32_1 = arith.constant 0 : i32
    return %c0_i32, %c0_i32_0 : i32, i32
  }
  func.func @transform_2(%arg0: i32) -> (i32, i32) {
    %c0_i32 = arith.constant 0 : i32
    %c0_i32_0 = arith.constant 0 : i32
    %c0_i32_1 = arith.constant 0 : i32
    return %c0_i32, %c0_i32_0 : i32, i32
  }
  func.func @transform_3(%arg0: i32) -> (i32, i32) {
    %c0_i32 = arith.constant 0 : i32
    %c0_i32_0 = arith.constant 0 : i32
    %c0_i32_1 = arith.constant 0 : i32
    return %c0_i32, %c0_i32_0 : i32, i32
  }
  func.func @transform_4(%arg0: i32) -> (i32, i32) {
    %c0_i32 = arith.constant 0 : i32
    %c0_i32_0 = arith.constant 0 : i32
    %c0_i32_1 = arith.constant 0 : i32
    return %c0_i32, %c0_i32_0 : i32, i32
  }
  func.func @transform_5(%arg0: i32) -> (i32, i32, i32) {
    %c0_i32 = arith.constant 0 : i32
    %c0_i32_0 = arith.constant 0 : i32
    %c0_i32_1 = arith.constant 0 : i32
    return %arg0, %c0_i32, %c0_i32_0 : i32, i32, i32
  }
}

</mosaic_0001>

<bundles_post_ra>
// kernel: tpu_custom_call.1
= control target key start
LH: loop header
LB: loop body
LE: loop exit
PB: predicated region body
PF: predicated region fallthrough
CT: control target
= control target key end

     0   :  { %10 = vsyncpa [#allocation3], 0  ;;  %s1754_s0 = inlined_call_operand.hbm [shape: f32[2,16,128], index: 0, kind: input, shape index: {}]   ;;  %s1755_s1 = inlined_call_operand.hbm [shape: bf16[384,128], index: 1, kind: input, shape index: {}]   ;;  %s1756_s2 = inlined_call_operand.vmem [shape: f32[1,128], index: 2, kind: input, shape index: {}]   ;;  %s1757_s3 = inlined_call_operand.hbm [shape: bf16[384,128], index: 3, kind: input, shape index: {}]   ;;  %s1758_s4 = inlined_call_operand.vmem [shape: f32[1,128], index: 4, kind: input, shape index: {}]   ;;  %s1759_s5 = inlined_call_operand.hbm [shape: f32[2,16,128], index: 5, kind: output, shape index: {}]  }
   0x1   :  { %12 = vsyncpa [#allocation3 + $0x1], 0 }
   0x2   :  { %13 = vsyncpa [#allocation6], 0 }
   0x3   :  { %14 = vsyncpa [#allocation4], 0 }
   0x4   :  { %16 = vsyncpa [#allocation4 + $0x1], 0  ;;  %s1498_s18 = smov 0   ;;  %s1500_s19 = smov 0  }
   0x5   :  { %s1502_s20 = smov 0   ;;  %s1504_s21 = smov 0  }
   0x6 LB: > { %s1519_s22 = sadd.s32 4294967295, %s1453_s21   ;;  %s995_s23 = sadd.s32 4294967294, %s1453_s21   ;;  %s1453_s21 = sphi %s1504_s21, %s1785_s21   ;;  %s1449_s20 = sphi %s1502_s20, %s1784_s20   ;;  %s1445_s19 = sphi %s1500_s19, %s1783_s19   ;;  %s1441_s18 = sphi %s1498_s18, %s1782_s18  }
   0x7   : > { %p42_p0 = scmp.ne.s32.totalorder %s1445_s19, %s1441_s18  ;;  %p1760_p1 = scmp.eq.s32.totalorder %s1519_s22, 0 }
   0x8   : > { %p156_p3 = scmp.eq.s32.totalorder %s995_s23, 1  ;;  %p996_p5 = scmp.ge.s32.totalorder %s1453_s21, 1 }
   0x9   : > { %p1528_p4 = por %p1760_p1, %p42_p0  ;;  %p163_p7 = scmp.lt.s32.totalorder %s1453_s21, 3 }
   0xa   : > { %p1533_p6 = por %p156_p3, %p42_p0  ;;  %s1455_s27 = smov [#allocation5]  }
   0xb   : > { %s1764_s24 = scalar_select %p1528_p4, 1, 0 }
   0xc   : > { %s1765_s25 = scalar_select %p1533_p6, 1, 0 }
   0xd   : > { %p1538_p8 = pnand %p996_p5, %p163_p7  ;;  %s175_s28 = sshll.u32 %s1455_s27, 4  ;;  %s176_s28 = int_to_ptr.vmem [resolvable:$true] %s175_s28 }
   0xe   : > { %s1456_s30 = smov [#allocation7]   ;;  %s1316_s7 = scalar_lea.vmem %s176_s28, 3072 }
   0xf   : > { %s1766_s26 = scalar_select %p1538_p8, 1, 0 }
  0x10   : > { %p1193_p9 = pneg %p1538_p8  ;;  %s191_s6 = sshll.u32 %s1456_s30, 4  ;;  %s192_s6 = int_to_ptr.vmem [resolvable:$true] %s191_s6 }
  0x11   : > { %p1317_p13 = scmp.ne.s32.totalorder %s176_s28, %s1316_s7  ;;  %p1324_p5 = scmp.lt.s32.totalorder %s176_s28, %s176_s28 }
  0x12   : > { %p1547_p11 = pnand %p1193_p9, %p1760_p1  ;;  %p1325_p7 = scmp.lt.s32.totalorder %s1316_s7, %s1316_s7 }
  0x14   : > { %p1307_p12 = pneg %p1547_p11  ;;  %p1326_p10 = por %p1325_p7, %p1324_p5 }
  0x16   : > { %p1319_p0 = pnand %p1317_p13, %p1307_p12 }
  0x18   : > { %p1320_p3 = pneg %p1319_p0 }
  0x1a   : > { %p1327_p9 = pnand %p1326_p10, %p1320_p3 }
  0x1c   : > { %1330 = shalt.err (!%p1327_p9)
}
  0x1d   : > { %s1457_s8 = smov 64   ;;  %s1458_s9 = smov 4  }
  0x1e   : > { %1196 = dma.hbm_to_vmem [thread:$0]  (!%p1547_p11), %s1755_s1, 3072, %s176_s28, [#allocation6], %s1457_s8, %s1457_s8, %s1458_s9  }
  0x1f   : > { %s1342_s12 = scalar_lea.vmem %s192_s6, 3072  ;;  %p1350_p2 = scmp.lt.s32.totalorder %s192_s6, %s192_s6 }
  0x20   : > { %p1343_p1 = scmp.ne.s32.totalorder %s192_s6, %s1342_s12  ;;  %p1351_p6 = scmp.lt.s32.totalorder %s1342_s12, %s1342_s12 }
  0x22   : > { %p1345_p13 = pnand %p1343_p1, %p1307_p12  ;;  %p1352_p5 = por %p1351_p6, %p1350_p2 }
  0x24   : > { %p1346_p0 = pneg %p1345_p13 }
  0x26   : > { %p1353_p10 = pnand %p1352_p5, %p1346_p0 }
  0x28   : > { %1356 = shalt.err (!%p1353_p10)
}
  0x29   : > { %1199 = dma.hbm_to_vmem [thread:$0]  (!%p1547_p11), %s1757_s3, 3072, %s192_s6, [#allocation6], %s1457_s8, %s1457_s8, %s1458_s9  }
  0x2a   : > { %s1570_s15 = sadd.s32 1, %s1453_s21   ;;  %s29_s16 = sadd.s32 1, %s1449_s20 }
  0x2b   : > { %s26_s17 = ssub.s32 %s1453_s21, %s1570_s15  ;;  %p36_p1 = scmp.ne.s32.totalorder %s1449_s20, %s1445_s19 }
  0x2c   : > { %p27_p2 = scmp.eq.s32.totalorder %s26_s17, 0  ;;  %p37_p6 = scmp.eq.s32.totalorder %s1453_s21, 0 }
  0x2d   : > { %p1768_p12 = scmp.eq.s32.totalorder %s1519_s22, 1  ;;  %p1210_p7 = scmp.lt.s32.totalorder %s1453_s21, 2 }
  0x2e   : > { %s1586_s27 = scalar_select %p27_p2, %s1449_s20, %s29_s16  }
  0x2f   : > { %p1580_p3 = por %p1768_p12, %p36_p1  ;;  %p38_p9 = por %p37_p6, %p36_p1 }
  0x30   : > { %s208_s28 = sand.u32 1, %s1449_s20   ;;  %s1077_s30 = sshll.u32 %s1453_s21, 8 }
  0x31   : > { %s1769_s23 = scalar_select %p1580_p3, 1, 0 }
  0x32   : > { %s1000_s29 = sshll.u32 %s208_s28, 4  ;;  %s1593_s8 = scalar_lea.hbm %s1754_s0, %s1077_s30 }
  0x33   : > { %s212_s9 = scalar_lea.vmem [#allocation2], %s1000_s29  ;;  %p1597_p11 = pnand %p1210_p7, %p38_p9 }
  0x34   : > { %s219_s10 = sshll.u32 %s212_s9, 4  ;;  %s1601_s12 = scalar_lea.sflag [#allocation3], %s208_s28  ;;  %s1595_s10 = int_to_ptr.vmem [resolvable:$true] %s219_s10 }
  0x35   : > { %s1357_s13 = scalar_lea.hbm %s1593_s8, 256  ;;  %p1359_p0 = pneg %p1597_p11 }
  0x36   : > { %p1358_p13 = scmp.ne.s32.totalorder %s1593_s8, %s1357_s13  ;;  %s1362_s17 = scalar_lea.hbm %s1754_s0, 512 }
  0x37   : > { %p1363_p1 = scmp.lt.s32.totalorder %s1593_s8, %s1754_s0  ;;  %p1364_p2 = scmp.lt.s32.totalorder %s1362_s17, %s1357_s13 }
  0x38   : > { %p1360_p5 = pnand %p1359_p0, %p1358_p13 }
  0x39   : > { %p1365_p6 = por %p1364_p2, %p1363_p1 }
  0x3a   : > { %p1361_p10 = pneg %p1360_p5 }
  0x3c   : > { %p1366_p12 = pnand %p1365_p6, %p1361_p10 }
  0x3e   : > { %1369 = shalt.err (!%p1366_p12)
}
  0x3f   : > { %s1370_s28 = scalar_lea.vmem %s1595_s10, 256  ;;  %s1459_s6 = smov [#allocation2]  }
  0x40   : > { %p1371_p7 = scmp.ne.s32.totalorder %s1595_s10, %s1370_s28  ;;  %s1375_s7 = sshll.u32 %s1459_s6, 4  ;;  %s1376_s7 = int_to_ptr.vmem [resolvable:$false] %s1375_s7 }
  0x41   : > { %s1377_s9 = scalar_lea.vmem %s1376_s7, 512  ;;  %p1378_p5 = scmp.lt.s32.totalorder %s1595_s10, %s1376_s7 }
  0x42   : > { %p1373_p9 = pnand %p1371_p7, %p1359_p0  ;;  %p1379_p3 = scmp.lt.s32.totalorder %s1377_s9, %s1370_s28 }
  0x44   : > { %p1374_p13 = pneg %p1373_p9  ;;  %p1380_p4 = por %p1379_p3, %p1378_p5 }
  0x46   : > { %p1381_p8 = pnand %p1380_p4, %p1374_p13 }
  0x48   : > { %1384 = shalt.err (!%p1381_p8)
}
  0x49   : > { %s1460_s13 = smov 128   ;;  %s1461_s14 = smov 8  }
  0x4a   : > { %1203 = dma.hbm_to_vmem [thread:$0]  (!%p1597_p11), %s1593_s8, 256, %s1595_s10, %s1601_s12, %s1460_s13, %s1460_s13, %s1461_s14  }
  0x4b   : > { %p1771_p0 = scmp.ne.s32.totalorder %s1766_s26, 0 }
  0x4c   : > { %s1625_s16 = sand.u32 (!%p1771_p0), 1, %s1445_s19   ;;  %p1772_p4 = scmp.ne.s32.totalorder (!%p1771_p0), %s1764_s24, 0 }
  0x4d   : > { %231 = sbr.rel (%p1771_p0) target bundleno = 554 (0x22a), region = 40  ;;  %s1004_s17 = sshll.u32 (!%p1771_p0), %s1625_s16, 4 }
  0x4e   : > { %s234_s29 = scalar_lea.sflag (!%p1771_p0), [#allocation3], %s1625_s16  ;;  %s1631_s30 = scalar_lea.vmem (!%p1771_p0), [#allocation2], %s1004_s17 }
  0x52   : > { %1428 = dma.done.wait (%p1772_p4), %s234_s29, 256  }
  0x53   : > { %1430 = vsyncadd (%p1772_p4), %s234_s29, 4294967040  ;;  %p1773_p8 = scmp.eq.s32.totalorder %s1519_s22, 0 }
  0x55   : > { %1432 = dma.done.wait (%p1773_p8), [#allocation6], 6144   ;;  %p1774_p3 = pmov %p1773_p8 }
  0x56   : > { %v1462_v0 = vmov 0.0   ;;  %vm1463_vm0 = vmmov 0   ;;  %v1257_v1 = vld [vmem:[#allocation5 + $0x78] sm:$0xff]   ;;  %v1260_v4 = vld [vmem:[#allocation5 + $0x70] sm:$0xff]   ;;  %v1263_v7 = vld [vmem:[#allocation5 + $0x68] sm:$0xff]   ;;  %vm283_vm1 = vcmask 1040384  }
  0x57   : > { %1434 = vsyncadd (%p1774_p3), [#allocation6], 4294961152  ;;  %1141 = vmatprep.subr.bf16.mxu1 %v1462_v0  ;;  %1157 = vmatprep.mubr.msk.bf16.mxu1 %vm1463_vm0, %v1462_v0  ;;  %v1258_v2 = vld [vmem:[#allocation5 + $0x38] sm:$0xff]   ;;  %v1261_v5 = vld [vmem:[#allocation5 + $0x30] sm:$0xff]   ;;  %vm290_vm5 = vcmask 1046528   ;;  %vm1464_vm6 = vmmov 1  }
  0x58   : > { %1079 = vmatprep.subr.bf16.mxu0 %v1257_v1  ;;  %v1259_v3 = vld [vmem:[#allocation5 + $0xb8] sm:$0xff]   ;;  %v1262_v6 = vld [vmem:[#allocation5 + $0xb0] sm:$0xff]   ;;  %v1264_v8 = vld [vmem:[#allocation5 + $0x28] sm:$0xff]   ;;  %s271_s11 = scalar_lea.vmem [#allocation8], %s1004_s17  ;;  %s1078_s28 = sshll.u32 %s1519_s22, 8 }
  0x59   : > { %1080 = vmatpush3.bf16.msra.mxu0 %v1258_v2  ;;  %1142 = vmatpush3.bf16.msra.mxu1 %v1259_v3  ;;  %v1265_v9 = vld [vmem:[#allocation5 + $0xa8] sm:$0xff]   ;;  %v1266_v10 = vld [vmem:[#allocation5 + $0x60] sm:$0xff]   ;;  %v1269_v13 = vld [vmem:[#allocation5 + $0x58] sm:$0xff]   ;;  %s903_s12 = sshll.u32 %s271_s11, 4  ;;  %s1708_s9 = scalar_lea.hbm %s1759_s5, %s1078_s28  ;;  %s1710_s12 = int_to_ptr.vmem [resolvable:$true] %s903_s12 }
  0x5a   : > { %1081 = vmatprep.subr.bf16.mxu0 %v1260_v4  ;;  %1143 = vmatprep.subr.bf16.mxu1 %v1462_v0  ;;  %v1267_v11 = vld [vmem:[#allocation5 + $0x20] sm:$0xff]   ;;  %v1270_v14 = vld [vmem:[#allocation5 + $0x18] sm:$0xff]   ;;  %v1272_v16 = vld [vmem:[#allocation5 + $0x50] sm:$0xff]   ;;  %s890_s13 = scalar_lea.sflag [#allocation4], %s1625_s16  ;;  %s1385_s14 = scalar_lea.vmem %s1710_s12, 256 }
  0x5b   : > { %v1268_v12 = vld [vmem:[#allocation5 + $0xa0] sm:$0xff]   ;;  %v1271_v15 = vld [vmem:[#allocation5 + $0x98] sm:$0xff]   ;;  %v1273_v17 = vld [vmem:[#allocation5 + $0x10] sm:$0xff]   ;;  %p1386_p11 = scmp.ne.s32.totalorder %s1710_s12, %s1385_s14  ;;  %p1779_p10 = scmp.ne.s32.totalorder %s1769_s23, 0 }
  0x5c   : > { %v1274_v18 = vld [vmem:[#allocation5 + $0x90] sm:$0xff]   ;;  %v1275_v19 = vld [vmem:[#allocation5 + $0x48] sm:$0xff]   ;;  %v1278_v22 = vld [vmem:[#allocation5 + $0x40] sm:$0xff]   ;;  %s1465_s22 = smov [#allocation8]  }
  0x5d   : > { %1082 = vmatpush3.bf16.msra.mxu0 %v1261_v5  ;;  %1144 = vmatpush3.bf16.msra.mxu1 %v1262_v6  ;;  %v1276_v20 = vld [vmem:[#allocation5 + $0x8] sm:$0xff]   ;;  %v1650_v23 = vld [vmem:[%s1631_s30] sm:$0xff]  ;;  %vm1033_vm4 = vmneg %vm283_vm1  ;;  %p1387_p1 = pnand %p1386_p11, %p1779_p10  ;;  %s1389_s17 = sshll.u32 %s1465_s22, 4  ;;  %s1390_s17 = int_to_ptr.vmem [resolvable:$false] %s1389_s17 }
  0x5e   : > { %1083 = vmatprep.subr.bf16.mxu0 %v1263_v7  ;;  %1145 = vmatprep.subr.bf16.mxu1 %v1462_v0  ;;  %v1277_v21 = vld [vmem:[#allocation5 + $0x88] sm:$0xff]   ;;  %v1279_v25 = vld [vmem:[#allocation5] sm:$0xff]   ;;  %vm275_vm2 = vcmp.gt.f32.partialorder %v1650_v23, 0.0  ;;  %v277_v26 = vmul.f32 0.1, %v1650_v23  ;;  %v1281_v31 = vld [vmem:[#allocation7 + $0x78] sm:$0xff]   ;;  %p1392_p6 = scmp.lt.s32.totalorder %s1710_s12, %s1390_s17 }
  0x5f   : > { %v1653_v24 = vld [vmem:[%s1631_s30 + $0x8] sm:$0xff]  ;;  %v1280_v28 = vld [vmem:[#allocation5 + $0x80] sm:$0xff]   ;;  %vm1663_vm7 = vmpackc.low %vm1464_vm6, %vm1033_vm4  ;;  %p1388_p2 = pneg %p1387_p1  ;;  %s1391_s29 = scalar_lea.vmem %s1390_s17, 512 }
  0x60   : > { %vm276_vm3 = vcmp.gt.f32.partialorder %v1653_v24, 0.0  ;;  %v278_v27 = vmul.f32 0.1, %v1653_v24  ;;  %v279_v29 = vsel %vm275_vm2, %v1650_v23, %v277_v26  ;;  %vm1669_vm8 = vmpackc.low %vm290_vm5, %vm1464_vm6  ;;  %v1282_v41 = vld [vmem:[#allocation7 + $0x38] sm:$0xff]   ;;  %v1284_v45 = vld [vmem:[#allocation7 + $0x70] sm:$0xff]   ;;  %p1393_p12 = scmp.lt.s32.totalorder %s1391_s29, %s1385_s14 }
  0x61   : > { %1084 = vmatpush3.bf16.msra.mxu0 %v1264_v8  ;;  %1146 = vmatpush3.bf16.msra.mxu1 %v1265_v9  ;;  %v284_v32 = vrot.slane %v279_v29, 7  ;;  %v291_v34 = vrot.slane %v279_v29, 1  ;;  %v1283_v44 = vld [vmem:[#allocation7 + $0xb8] sm:$0xff]   ;;  %v1285_v46 = vld [vmem:[#allocation7 + $0x30] sm:$0xff]   ;;  %v1287_v48 = vld [vmem:[#allocation7 + $0x68] sm:$0xff]  }
  0x62   : > { %1085 = vmatprep.subr.bf16.mxu0 %v1266_v10  ;;  %1147 = vmatprep.subr.bf16.mxu1 %v1462_v0  ;;  %v280_v30 = vsel %vm276_vm3, %v1653_v24, %v278_v27  ;;  %v1286_v47 = vld [vmem:[#allocation7 + $0xb0] sm:$0xff]   ;;  %v1288_v49 = vld [vmem:[#allocation7 + $0x28] sm:$0xff]   ;;  %v1290_v51 = vld [vmem:[#allocation7 + $0x60] sm:$0xff]   ;;  %p1394_p7 = por %p1393_p12, %p1392_p6 }
  0x63   : > { %v285_v33 = vrot.slane %v280_v30, 7  ;;  %v292_v35 = vrot.slane %v280_v30, 1  ;;  %v298_v37 = vpack.c.bf16 %v280_v30, %v279_v29  ;;  %v1289_v50 = vld [vmem:[#allocation7 + $0xa8] sm:$0xff]   ;;  %v1291_v52 = vld [vmem:[#allocation7 + $0x20] sm:$0xff]   ;;  %v1293_v54 = vld [vmem:[#allocation7 + $0x58] sm:$0xff]  }
  0x64   : > { %v1292_v53 = vld [vmem:[#allocation7 + $0xa0] sm:$0xff]   ;;  %v1294_v55 = vld [vmem:[#allocation7 + $0x18] sm:$0xff]   ;;  %v1296_v57 = vld [vmem:[#allocation7 + $0x50] sm:$0xff]   ;;  %p1395_p9 = pnand %p1394_p7, %p1388_p2 }
  0x65   : > { %1086 = vmatpush3.bf16.msra.mxu0 %v1267_v11  ;;  %1148 = vmatpush3.bf16.msra.mxu1 %v1268_v12  ;;  %v286_v39 = vsel %vm283_vm1, %v284_v32, %v285_v33  ;;  %v293_v40 = vsel %vm290_vm5, %v291_v34, %v292_v35  ;;  %v1295_v56 = vld [vmem:[#allocation7 + $0x98] sm:$0xff]   ;;  %v1297_v58 = vld [vmem:[#allocation7 + $0x10] sm:$0xff]   ;;  %v1299_v60 = vld [vmem:[#allocation7 + $0x48] sm:$0xff]  }
  0x66   : > { %1087 = vmatprep.subr.bf16.mxu0 %v1269_v13  ;;  %1149 = vmatprep.subr.bf16.mxu1 %v1462_v0  ;;  %v1035_v42 = vpack.c.bf16 %v286_v39, %v284_v32  ;;  %v1038_v43 = vpack.c.bf16 %v292_v35, %v293_v40  ;;  %v1298_v59 = vld [vmem:[#allocation7 + $0x90] sm:$0xff]   ;;  %v1300_v61 = vld [vmem:[#allocation7 + $0x8] sm:$0xff]   ;;  %v1302_v63 = vld [vmem:[#allocation7 + $0x40] sm:$0xff]  }
  0x67   : > { %531 = vmatprep.mubr.bf16.mxu0 %v298_v37  ;;  %v1301_v62 = vld [vmem:[#allocation7 + $0x88] sm:$0xff]   ;;  %v1303_v1 = vld [vmem:[#allocation7] sm:$0xff]  }
  0x68   : > { %v1304_v2 = vld [vmem:[#allocation7 + $0x80] sm:$0xff]  }
  0x69   : > { %1088 = vmatpush3.bf16.msra.mxu0 %v1270_v14  ;;  %1150 = vmatpush3.bf16.msra.mxu1 %v1271_v15  ;;  %v1008_v5 = vld [vmem:[%s1756_s2] ss:$0 sm:$0xff] }
  0x6a   : > { %1089 = vmatprep.subr.bf16.mxu0 %v1272_v16  ;;  %1151 = vmatprep.subr.bf16.mxu1 %v1462_v0  ;;  %v1040_v34 = vld [vmem:[%s1758_s4] ss:$0 sm:$0xff] }
  0x6d   : > { %1090 = vmatpush3.bf16.msra.mxu0 %v1273_v17  ;;  %1152 = vmatpush3.bf16.msra.mxu1 %v1274_v18 }
  0x6e   : > { %1091 = vmatprep.subr.bf16.mxu0 %v1275_v19  ;;  %1153 = vmatprep.subr.bf16.mxu1 %v1462_v0 }
  0x71   : > { %1092 = vmatpush3.bf16.msra.mxu0 %v1276_v20  ;;  %1154 = vmatpush3.bf16.msra.mxu1 %v1277_v21 }
  0x72   : > { %1093 = vmatprep.subr.bf16.mxu0 %v1278_v22  ;;  %1155 = vmatprep.subr.bf16.mxu1 %v1462_v0 }
  0x75   : > { %1094 = vmatpush3.bf16.msra.mxu0 %v1279_v25  ;;  %1156 = vmatpush3.bf16.msra.mxu1 %v1280_v28 }
  0x76   : > { %1110 = vmatprep.subr.bf16.mxu0 %v1281_v31  ;;  %1161 = vmatprep.subr.bf16.mxu1 %v1462_v0 }
  0x78   : > { %1036 = vmatmul.mubr.msk.bf16.vlgmr.msra.gmra.mxu0 %vm1663_vm7, %v1035_v42  ;;  %1158 = vmatmul.mubr.msk.bf16.vlgmr.msra.gmra.mxu1 %vm1669_vm8, %v1038_v43 }
  0x79   : > { %1111 = vmatpush3.bf16.msra.mxu0 %v1282_v41  ;;  %1162 = vmatpush3.bf16.msra.mxu1 %v1283_v44 }
  0x7a   : > { %1112 = vmatprep.subr.bf16.mxu0 %v1284_v45  ;;  %1163 = vmatprep.subr.bf16.mxu1 %v1462_v0 }
  0x7b   : > { %1177 = vmatprep.mubr.msk.bf16.mxu1 %vm1463_vm0, %v1462_v0 }
  0x7d   : > { %1113 = vmatpush3.bf16.msra.mxu0 %v1285_v46  ;;  %1164 = vmatpush3.bf16.msra.mxu1 %v1286_v47 }
  0x7e   : > { %1114 = vmatprep.subr.bf16.mxu0 %v1287_v48  ;;  %1165 = vmatprep.subr.bf16.mxu1 %v1462_v0 }
  0x81   : > { %1115 = vmatpush3.bf16.msra.mxu0 %v1288_v49  ;;  %1166 = vmatpush3.bf16.msra.mxu1 %v1289_v50 }
  0x82   : > { %1167 = vmatprep.subr.bf16.mxu1 %v1462_v0  ;;  %1116 = vmatprep.subr.bf16.mxu0 %v1290_v51 }
  0x85   : > { %1117 = vmatpush3.bf16.msra.mxu0 %v1291_v52  ;;  %1168 = vmatpush3.bf16.msra.mxu1 %v1292_v53 }
  0x86   : > { %1169 = vmatprep.subr.bf16.mxu1 %v1462_v0  ;;  %1118 = vmatprep.subr.bf16.mxu0 %v1293_v54 }
  0x89   : > { %1119 = vmatpush3.bf16.msra.mxu0 %v1294_v55  ;;  %1170 = vmatpush3.bf16.msra.mxu1 %v1295_v56 }
  0x8a   : > { %1171 = vmatprep.subr.bf16.mxu1 %v1462_v0  ;;  %1120 = vmatprep.subr.bf16.mxu0 %v1296_v57 }
  0x8d   : > { %1121 = vmatpush3.bf16.msra.mxu0 %v1297_v58  ;;  %1172 = vmatpush3.bf16.msra.mxu1 %v1298_v59 }
  0x8e   : > { %1173 = vmatprep.subr.bf16.mxu1 %v1462_v0  ;;  %1122 = vmatprep.subr.bf16.mxu0 %v1299_v60 }
  0x91   : > { %1123 = vmatpush3.bf16.msra.mxu0 %v1300_v61  ;;  %1174 = vmatpush3.bf16.msra.mxu1 %v1301_v62 }
  0x92   : > { %1124 = vmatprep.subr.bf16.mxu0 %v1302_v63  ;;  %1175 = vmatprep.subr.bf16.mxu1 %v1462_v0 }
  0x95   : > { %1125 = vmatpush3.bf16.msra.mxu0 %v1303_v1  ;;  %1176 = vmatpush3.bf16.msra.mxu1 %v1304_v2 }
 0x138   : > { %v1095_v3 = vpop.f32.mrf.mxu0  ;;  %v574_v4 = vpop.f32.mrf.mxu1 }
 0x13a   : > { %v1096_v6 = vpop.f32.mrf.mxu0  ;;  %v1159_v8 = vpop.f32.mrf.mxu1 }
 0x13b   : > { %v1097_v7 = vadd.f32 %v1096_v6, %v1095_v3 }
 0x13c   : > { %v1098_v9 = vpop.f32.mrf.mxu0  ;;  %v577_v11 = vpop.f32.mrf.mxu1 }
 0x13d   : > { %v534_v10 = vadd.f32 %v1097_v7, %v1008_v5 }
 0x13e   : > { %v1099_v12 = vpop.f32.mrf.mxu0  ;;  %v1160_v15 = vpop.f32.mrf.mxu1 }
 0x13f   : > { %v575_v13 = vadd.f32 %v574_v4, %v534_v10  ;;  %v1100_v14 = vadd.f32 %v1099_v12, %v1098_v9 }
 0x141   : > { %v583_v0 = vmul.f32 0.1, %v575_v13  ;;  %v537_v16 = vadd.f32 %v1100_v14, %v1008_v5  ;;  %vm581_vm9 = vcmp.gt.f32.partialorder %v575_v13, 0.0 }
 0x143   : > { %v578_v17 = vadd.f32 %v577_v11, %v537_v16  ;;  %v585_v18 = vsel %vm581_vm9, %v575_v13, %v583_v0 }
 0x144   : > { %v589_v21 = vrot.slane %v585_v18, 7  ;;  %v595_v25 = vrot.slane %v585_v18, 1 }
 0x145   : > { %v584_v19 = vmul.f32 0.1, %v578_v17  ;;  %vm582_vm10 = vcmp.gt.f32.partialorder %v578_v17, 0.0 }
 0x147   : > { %v586_v20 = vsel %vm582_vm10, %v578_v17, %v584_v19 }
 0x148   : > { %v590_v22 = vrot.slane %v586_v20, 7  ;;  %v596_v26 = vrot.slane %v586_v20, 1  ;;  %v602_v27 = vpack.c.bf16 %v586_v20, %v585_v18 }
 0x14a   : > { %v591_v28 = vsel %vm283_vm1, %v589_v21, %v590_v22  ;;  %v597_v29 = vsel %vm290_vm5, %v595_v25, %v596_v26  ;;  %835 = vmatprep.mubr.bf16.mxu0 %v602_v27 }
 0x14b   : > { %v1067_v30 = vpack.c.bf16 %v591_v28, %v589_v21  ;;  %v1070_v31 = vpack.c.bf16 %v596_v26, %v597_v29 }
 0x14d   : > { %1068 = vmatmul.mubr.msk.bf16.vlgmr.msra.gmra.mxu0 %vm1663_vm7, %v1067_v30  ;;  %1178 = vmatmul.mubr.msk.bf16.vlgmr.msra.gmra.mxu1 %vm1669_vm8, %v1070_v31 }
 0x20d   : > { %v1126_v32 = vpop.f32.mrf.mxu0  ;;  %v878_v33 = vpop.f32.mrf.mxu1 }
 0x20f   : > { %v1127_v35 = vpop.f32.mrf.mxu0  ;;  %v1179_v37 = vpop.f32.mrf.mxu1 }
 0x210   : > { %v1128_v39 = vadd.f32 %v1127_v35, %v1126_v32 }
 0x211   : > { %v1129_v40 = vpop.f32.mrf.mxu0  ;;  %v881_v41 = vpop.f32.mrf.mxu1 }
 0x212   : > { %v838_v42 = vadd.f32 %v1128_v39, %v1040_v34 }
 0x213   : > { %v1130_v36 = vpop.f32.mrf.mxu0  ;;  %v1180_v43 = vpop.f32.mrf.mxu1 }
 0x214   : > { %v879_v44 = vadd.f32 %v878_v33, %v838_v42  ;;  %v1131_v38 = vadd.f32 %v1130_v36, %v1129_v40 }
 0x216   : > { %v885_v45 = vadd.f32 %v879_v44, %v1650_v23  ;;  %v841_v46 = vadd.f32 %v1131_v38, %v1040_v34 }
 0x218   : > { %887 = vst [vmem:[%s271_s11] sm:$0xff] %v885_v45  ;;  %v882_v47 = vadd.f32 %v881_v41, %v841_v46 }
 0x21a   : > { %v886_v48 = vadd.f32 %v882_v47, %v1653_v24 }
 0x21c   : > { %888 = vst [vmem:[%s271_s11 + $0x8] sm:$0xff] %v886_v48 }
 0x21d   : > { %1398 = shalt.err (!%p1395_p9)
}
 0x21e   : > { %s1399_s30 = scalar_lea.hbm %s1708_s9, 256  ;;  %s1403_s8 = scalar_lea.hbm %s1759_s5, 512 }
 0x21f   : > { %p1400_p13 = scmp.ne.s32.totalorder %s1708_s9, %s1399_s30  ;;  %p1404_p4 = scmp.lt.s32.totalorder %s1708_s9, %s1759_s5 }
 0x220   : > { %p1405_p8 = scmp.lt.s32.totalorder %s1403_s8, %s1399_s30 }
 0x221   : > { %p1401_p5 = pnand %p1400_p13, %p1779_p10 }
 0x222   : > { %p1406_p3 = por %p1405_p8, %p1404_p4 }
 0x223   : > { %p1402_p0 = pneg %p1401_p5 }
 0x225   : > { %p1407_p11 = pnand %p1406_p3, %p1402_p0 }
 0x227   : > { %1410 = shalt.err (!%p1407_p11)
}
 0x228   : > { %s1466_s28 = smov 128   ;;  %s1467_s6 = smov 8  }
 0x229   : > { %1191 = dma.vmem_to_hbm [thread:$0]  (%p1779_p10), %s1710_s12, 256, %s1708_s9, %s890_s13, %s1466_s28, %s1466_s28, %s1467_s6  }
 0x22a PF: > { %s918_s7 = sand.u32 1, %s1441_s18   ;;  %p1780_p1 = scmp.ne.s32.totalorder %s1765_s25, 0 }
 0x22b   : > { %p1781_p2 = scmp.ge.s32.totalorder %s1453_s21, 2  ;;  %s919_s14 = scalar_lea.sflag [#allocation4], %s918_s7 }
 0x22d   : > { %p1205_p6 = pnand %p1781_p2, %p1780_p1 }
 0x22f   : > { %p1206_p12 = pneg %p1205_p6 }
 0x231   : > { %1436 = dma.done.wait (%p1206_p12), %s919_s14, 256  }
 0x232   : > { %1438 = vsyncadd (%p1206_p12), %s919_s14, 4294967040  ;;  %p19_p7 = scmp.ge.s32.totalorder %s1570_s15, 4   ;;  %s1782_s18 = smov %s1445_s19 }
 0x233   : > { %s1783_s19 = smov %s1449_s20  ;;  %s1784_s20 = smov %s1586_s27 }
 0x234   : > { %s1785_s21 = smov %s1570_s15  ;;  %21 = sbr.rel (!%p19_p7) target bundleno = 6 (0x6), region = 93 }
 0x239   :  { %924 = vsyncpa [#allocation3], 1 }
 0x23a   :  { %926 = vsyncpa [#allocation3 + $0x1], 1 }
 0x23b   :  { %927 = vsyncpa [#allocation6], 1 }
 0x23c   :  { %928 = vsyncpa [#allocation4], 1 }
 0x23d   :  { %930 = vsyncpa [#allocation4 + $0x1], 1 }

</bundles_post_ra>
